<compile_context>
chip_gen: v7x
topology: tpu7x:2x2x1
jax: 0.10.0
libtpu: 0.0.40
codegen_flags: <defaults>
</compile_context>

<pallas_src>
import math
import jax
import jax.numpy as jnp
from jax.experimental import pallas as pl
from jax.experimental.pallas import tpu as pltpu


def _round_up(x, m):
    return ((x + m - 1) // m) * m


def _cdiv(a, b):
    return -(-a // b)


def _choose_tb(batch, block_b):
    """Batch tile: multiple of 8, big enough to amortize per-step overhead,
    and yielding >= 2 grid steps whenever batch >= 16 (v7x megacore)."""
    block_b = max(8, (block_b // 8) * 8)          # force sublane multiple
    if batch < 16:
        return min(block_b, _round_up(batch, 8))  # single step is fine
    if batch >= 2 * block_b:
        return block_b                            # big batch: full tiles, >=2 steps
    return min(block_b, _round_up(_cdiv(batch, 2), 8))  # split ~evenly into 2 steps


def critic_kernel(x_ref, w1_ref, b1_ref, w2_ref, b2_ref, w3_ref, b3_ref, o_ref):
    # Layer 1 (MXU): (TB, D) @ (D, H1), bf16 operands, f32 accumulation.
    a1 = jnp.dot(x_ref[...].astype(jnp.bfloat16), w1_ref[...],
                 preferred_element_type=jnp.float32) + b1_ref[...]
    # tanh in bf16: h1 feeds a bf16 matmul anyway; halves EUP work on v6e/v7x.
    h1 = jnp.tanh(a1.astype(jnp.bfloat16))

    # Layer 2 (MXU): (TB, H1) @ (H1, H2), bf16 operands, f32 accumulation.
    a2 = jnp.dot(h1, w2_ref[...], preferred_element_type=jnp.float32) + b2_ref[...]
    h2 = jnp.tanh(a2.astype(jnp.bfloat16))

    # Output layer (fan_out = 1), computed as w3 @ h2^T so the batch dimension
    # lands on lanes: lane-dense (1, TB) row -> unmasked vector stores and a
    # dense output DMA.  w3 is stored as (8, H2) bf16 with the real weight in
    # row 0 and zeros elsewhere (sublane-aligned MXU M-dim).
    res = jax.lax.dot_general(
        w3_ref[...], h2,
        dimension_numbers=(((1,), (1,)), ((), ())),   # contract H2 with H2
        preferred_element_type=jnp.float32)           # (8, TB) f32
    row = res[0:1, :] + b3_ref[0, 0]                  # (1, TB) f32
    o_ref[...] = row[None]                            # (1, 1, TB)


def critic_forward(x, params, block_b=2048):
    """x: (B, input_dims) float32.  Returns (B, 1) float32."""
    w1, b1, w2, b2, w3, b3 = params
    B, D = x.shape
    H1 = w1.shape[1]
    H2 = w2.shape[1]

    tb = _choose_tb(B, block_b)
    Bp = _round_up(B, tb)
    if Bp != B:
        x = jnp.pad(x, ((0, Bp - B), (0, 0)))
    num_blocks = Bp // tb

    cost = pl.CostEstimate(
        flops=2 * Bp * (D * H1 + H1 * H2 + H2),
        transcendentals=Bp * (H1 + H2),
        bytes_accessed=(Bp * D * 4 + Bp * 4
                        + w1.size * 2 + w2.size * 2 + w3.size * 2
                        + (b1.size + b2.size + b3.size) * 4),
    )

    out = pl.pallas_call(
        critic_kernel,
        out_shape=jax.ShapeDtypeStruct((num_blocks, 1, tb), jnp.float32),
        grid=(num_blocks,),
        in_specs=[
            # Batch-tiled activations (double-buffered by BlockSpec).
            pl.BlockSpec((tb, D), lambda i: (i, 0)),
            # Weights / biases: constant index_map -> VMEM-resident, no re-DMA.
            pl.BlockSpec((D, H1), lambda i: (0, 0)),
            pl.BlockSpec((1, H1), lambda i: (0, 0)),
            pl.BlockSpec((H1, H2), lambda i: (0, 0)),
            pl.BlockSpec((1, H2), lambda i: (0, 0)),
            pl.BlockSpec((8, H2), lambda i: (0, 0)),
            # b3 is a single scalar: keep it in SMEM, untiled.
            pl.BlockSpec(memory_space=pltpu.MemorySpace.SMEM),
        ],
        out_specs=pl.BlockSpec((1, 1, tb), lambda i: (i, 0, 0)),
        compiler_params=pltpu.CompilerParams(
            dimension_semantics=("parallel",),
            vmem_limit_bytes=32 * 1024 * 1024,   # v5e scoped default is 16 MiB
        ),
        cost_estimate=cost,
    )(x, w1, b1, w2, b2, w3, b3)

    # (num_blocks, 1, tb) -> (Bp,) -> (B, 1); rows are in batch order.
    return out.reshape(-1)[:B][:, None]


def init_params(key, input_dims, h1_size=256, h2_size=256):
    """Deterministic init mimicking torch.nn.Linear (uniform +/- 1/sqrt(fan_in)).

    w1/w2 are stored bf16 (fan_in, fan_out); biases f32 (1, fan_out).  w3 is
    stored as a bf16 (8, h2_size) matrix whose row 0 is the real (1, h2)
    weight row (rows 1..7 are zeros); b3 is an f32 (1, 1) scalar.
    """
    def linear(k, fan_in, fan_out):
        kw, kb = jax.random.split(k)
        bound = 1.0 / math.sqrt(fan_in)
        w = jax.random.uniform(kw, (fan_in, fan_out), jnp.float32, -bound, bound)
        b = jax.random.uniform(kb, (1, fan_out), jnp.float32, -bound, bound)
        return w, b

    k1, k2, k3 = jax.random.split(key, 3)
    w1, b1 = linear(k1, input_dims, h1_size)
    w2, b2 = linear(k2, h1_size, h2_size)
    w3, b3 = linear(k3, h2_size, 1)
    w3_pad = jnp.zeros((8, h2_size), jnp.float32).at[0:1, :].set(w3.T)
    return (w1.astype(jnp.bfloat16), b1,
            w2.astype(jnp.bfloat16), b2,
            w3_pad.astype(jnp.bfloat16), b3)


def critic_reference(x, params):
    """Pure-JAX reference using the same precision pipeline as the kernel."""
    w1, b1, w2, b2, w3, b3 = params
    a1 = jnp.dot(x.astype(jnp.bfloat16), w1, preferred_element_type=jnp.float32) + b1
    h1 = jnp.tanh(a1.astype(jnp.bfloat16))
    a2 = jnp.dot(h1, w2, preferred_element_type=jnp.float32) + b2
    h2 = jnp.tanh(a2.astype(jnp.bfloat16))
    out = jnp.dot(h2.astype(jnp.float32), w3[0].astype(jnp.float32)) + b3[0, 0]
    return out[:, None]


if __name__ == "__main__":
    key = jax.random.PRNGKey(0)
    k_param, k_a, k_b, k_c = jax.random.split(key, 4)

    input_dims = 8          # Critic(input_dims=(8,))
    params = init_params(k_param, input_dims)

    def check(x, block_b, name):
        out = critic_forward(x, params, block_b=block_b)
        jax.block_until_ready(out)
        ref = critic_reference(x, params)
        assert out.shape == (x.shape[0], 1), f"{name}: bad shape {out.shape}"
        assert jnp.allclose(out, ref, atol=5e-3, rtol=5e-3), \
            f"{name}: mismatch vs reference"

    # Tiny batch: single grid step.
    check(jax.random.normal(k_a, (8, input_dims), jnp.float32), 2048, "small")
    # Mid batch: padding 200 -> 208, 2 grid steps (v7x megacore), resident weights.
    check(jax.random.normal(k_b, (200, input_dims), jnp.float32), 2048, "mid")
    # Larger batch with small tiles: 4 grid steps, 128-aligned lane-dense output.
    check(jax.random.normal(k_c, (512, input_dims), jnp.float32), 128, "tiled")

    print("KERNEL_OK")
</pallas_src>

<mosaic_0001>
module attributes {stable_mosaic.version = 11 : i64} {
  func.func @critic_kernel(%arg0: i32, %arg1: memref<8x8xf32, #tpu.memory_space<vmem>>, %arg2: memref<8x256xbf16, #tpu.memory_space<vmem>>, %arg3: memref<1x256xf32, #tpu.memory_space<vmem>>, %arg4: memref<256x256xbf16, #tpu.memory_space<vmem>>, %arg5: memref<1x256xf32, #tpu.memory_space<vmem>>, %arg6: memref<8x256xbf16, #tpu.memory_space<vmem>>, %arg7: memref<1x1xf32, #tpu.memory_space<smem>>, %arg8: memref<1x1x8xf32, #tpu.memory_space<vmem>>) attributes {dimension_semantics = [#tpu.dimension_semantics<parallel>], iteration_bounds = array<i64: 1>, scalar_prefetch = 0 : i64, scratch_operands = 0 : i64, tpu.core_type = #tpu.core_type<tc>, window_params = [{transform_indices = @transform_0, window_bounds = array<i64: 8, 8>}, {pipeline_mode = #tpu.pipeline_mode<synchronous>, transform_indices = @transform_1, window_bounds = array<i64: 8, 256>}, {pipeline_mode = #tpu.pipeline_mode<synchronous>, transform_indices = @transform_2, window_bounds = array<i64: 1, 256>}, {pipeline_mode = #tpu.pipeline_mode<synchronous>, transform_indices = @transform_3, window_bounds = array<i64: 256, 256>}, {pipeline_mode = #tpu.pipeline_mode<synchronous>, transform_indices = @transform_4, window_bounds = array<i64: 1, 256>}, {pipeline_mode = #tpu.pipeline_mode<synchronous>, transform_indices = @transform_5, window_bounds = array<i64: 8, 256>}, {transform_indices = @transform_6, window_bounds = array<i64: 1, 1>}, {transform_indices = @transform_7, window_bounds = array<i64: 1, 1, 8>}]} {
    %c0 = arith.constant 0 : index
    %c0_0 = arith.constant 0 : index
    %0 = vector.load %arg1[%c0, %c0_0] : memref<8x8xf32, #tpu.memory_space<vmem>>, vector<8x8xf32>
    %1 = arith.truncf %0 : vector<8x8xf32> to vector<8x8xbf16>
    %c0_1 = arith.constant 0 : index
    %c0_2 = arith.constant 0 : index
    %2 = vector.load %arg2[%c0_1, %c0_2] : memref<8x256xbf16, #tpu.memory_space<vmem>>, vector<8x256xbf16>
    %cst = arith.constant dense<0.000000e+00> : vector<8x256xf32>
    %3 = tpu.matmul %1, %2, %cst {dimension_numbers = #tpu.dot_dimension_numbers<[1], [0], [0], [1], [0, 0, 1, 1], [], []>} : vector<8x8xbf16>, vector<8x256xbf16>, vector<8x256xf32> -> vector<8x256xf32>
    %c0_3 = arith.constant 0 : index
    %c0_4 = arith.constant 0 : index
    %4 = vector.load %arg3[%c0_3, %c0_4] : memref<1x256xf32, #tpu.memory_space<vmem>>, vector<1x256xf32>
    %5 = vector.broadcast %4 : vector<1x256xf32> to vector<8x256xf32>
    %6 = arith.addf %3, %5 : vector<8x256xf32>
    %7 = arith.truncf %6 : vector<8x256xf32> to vector<8x256xbf16>
    %8 = math.tanh %7 : vector<8x256xbf16>
    %c0_5 = arith.constant 0 : index
    %c0_6 = arith.constant 0 : index
    %9 = vector.load %arg4[%c0_5, %c0_6] : memref<256x256xbf16, #tpu.memory_space<vmem>>, vector<256x256xbf16>
    %cst_7 = arith.constant dense<0.000000e+00> : vector<8x256xf32>
    %10 = tpu.matmul %8, %9, %cst_7 {dimension_numbers = #tpu.dot_dimension_numbers<[1], [0], [0], [1], [0, 0, 1, 1], [], []>} : vector<8x256xbf16>, vector<256x256xbf16>, vector<8x256xf32> -> vector<8x256xf32>
    %c0_8 = arith.constant 0 : index
    %c0_9 = arith.constant 0 : index
    %11 = vector.load %arg5[%c0_8, %c0_9] : memref<1x256xf32, #tpu.memory_space<vmem>>, vector<1x256xf32>
    %12 = vector.broadcast %11 : vector<1x256xf32> to vector<8x256xf32>
    %13 = arith.addf %10, %12 : vector<8x256xf32>
    %14 = arith.truncf %13 : vector<8x256xf32> to vector<8x256xbf16>
    %15 = math.tanh %14 : vector<8x256xbf16>
    %c0_10 = arith.constant 0 : index
    %c0_11 = arith.constant 0 : index
    %16 = vector.load %arg6[%c0_10, %c0_11] : memref<8x256xbf16, #tpu.memory_space<vmem>>, vector<8x256xbf16>
    %cst_12 = arith.constant dense<0.000000e+00> : vector<8x8xf32>
    %17 = tpu.matmul %16, %15, %cst_12 {dimension_numbers = #tpu.dot_dimension_numbers<[1], [1], [0], [0], [0, 0, 1, 0], [], []>} : vector<8x256xbf16>, vector<8x256xbf16>, vector<8x8xf32> -> vector<8x8xf32>
    %18 = vector.extract_strided_slice %17 {offsets = [0, 0], sizes = [1, 8], strides = [1, 1]} : vector<8x8xf32> to vector<1x8xf32>
    %c0_13 = arith.constant 0 : index
    %c0_14 = arith.constant 0 : index
    %19 = memref.load %arg7[%c0_13, %c0_14] : memref<1x1xf32, #tpu.memory_space<smem>>
    %20 = vector.broadcast %19 : f32 to vector<1x8xf32>
    %21 = arith.addf %18, %20 : vector<1x8xf32>
    %22 = vector.shape_cast %21 : vector<1x8xf32> to vector<1x1x8xf32>
    %c0_15 = arith.constant 0 : index
    %c0_16 = arith.constant 0 : index
    %c0_17 = arith.constant 0 : index
    %23 = vector.load %arg8[%c0_15, %c0_16, %c0_17] : memref<1x1x8xf32, #tpu.memory_space<vmem>>, vector<1x1x8xf32>
    tpu.vector_store %arg8[%c0_15, %c0_16, %c0_17], %22 {strides = array<i32>} : memref<1x1x8xf32, #tpu.memory_space<vmem>>, vector<1x1x8xf32>,
    return
  }
  func.func @transform_0(%arg0: i32) -> (i32, i32) {
    %c0_i32 = arith.constant 0 : i32
    %c0_i32_0 = arith.constant 0 : i32
    return %arg0, %c0_i32 : i32, i32
  }
  func.func @transform_1(%arg0: i32) -> (i32, i32) {
    %c0_i32 = arith.constant 0 : i32
    %c0_i32_0 = arith.constant 0 : i32
    %c0_i32_1 = arith.constant 0 : i32
    return %c0_i32, %c0_i32_0 : i32, i32
  }
  func.func @transform_2(%arg0: i32) -> (i32, i32) {
    %c0_i32 = arith.constant 0 : i32
    %c0_i32_0 = arith.constant 0 : i32
    %c0_i32_1 = arith.constant 0 : i32
    return %c0_i32, %c0_i32_0 : i32, i32
  }
  func.func @transform_3(%arg0: i32) -> (i32, i32) {
    %c0_i32 = arith.constant 0 : i32
    %c0_i32_0 = arith.constant 0 : i32
    %c0_i32_1 = arith.constant 0 : i32
    return %c0_i32, %c0_i32_0 : i32, i32
  }
  func.func @transform_4(%arg0: i32) -> (i32, i32) {
    %c0_i32 = arith.constant 0 : i32
    %c0_i32_0 = arith.constant 0 : i32
    %c0_i32_1 = arith.constant 0 : i32
    return %c0_i32, %c0_i32_0 : i32, i32
  }
  func.func @transform_5(%arg0: i32) -> (i32, i32) {
    %c0_i32 = arith.constant 0 : i32
    %c0_i32_0 = arith.constant 0 : i32
    %c0_i32_1 = arith.constant 0 : i32
    return %c0_i32, %c0_i32_0 : i32, i32
  }
  func.func @transform_6(%arg0: i32) -> (i32, i32) {
    %c0_i32 = arith.constant 0 : i32
    %c0_i32_0 = arith.constant 0 : i32
    %c0_i32_1 = arith.constant 0 : i32
    return %c0_i32, %c0_i32_0 : i32, i32
  }
  func.func @transform_7(%arg0: i32) -> (i32, i32, i32) {
    %c0_i32 = arith.constant 0 : i32
    %c0_i32_0 = arith.constant 0 : i32
    %c0_i32_1 = arith.constant 0 : i32
    return %arg0, %c0_i32, %c0_i32_0 : i32, i32, i32
  }
}

</mosaic_0001>

<bundles_post_ra>
// kernel: tpu_custom_call.1
= control target key start
LH: loop header
LB: loop body
LE: loop exit
PB: predicated region body
PF: predicated region fallthrough
CT: control target
= control target key end

     0   :  { %13 = vsyncpa [#allocation4], 0  ;;  %s766_s0 = inlined_call_operand.hbm [shape: f32[8,8], index: 0, kind: input, shape index: {}]   ;;  %s767_s1 = inlined_call_operand.hbm [shape: bf16[8,256], index: 1, kind: input, shape index: {}]   ;;  %s768_s2 = inlined_call_operand.vmem [shape: f32[1,256], index: 2, kind: input, shape index: {}]   ;;  %s769_s3 = inlined_call_operand.hbm [shape: bf16[256,256], index: 3, kind: input, shape index: {}]   ;;  %s770_s4 = inlined_call_operand.vmem [shape: f32[1,256], index: 4, kind: input, shape index: {}]   ;;  %s771_s5 = inlined_call_operand.vmem [shape: bf16[8,256], index: 5, kind: input, shape index: {}]   ;;  %s772_s6 = inlined_call_operand.<no memory space> [shape: f32[1,1], index: 6, kind: input, shape index: {}]   ;;  %s773_s7 = inlined_call_operand.hbm [shape: f32[1,1,8], index: 7, kind: output, shape index: {}]  }
   0x1   :  { %14 = vsyncpa [#allocation7], 0 }
   0x2   :  { %15 = vsyncpa [#allocation5], 0  ;;  %s659_s24 = smov [#allocation6]   ;;  %s660_s26 = smov [#allocation3]  }
   0x3   :  { %s32_s25 = sshll.u32 %s659_s24, 4  ;;  %s22_s27 = sshll.u32 %s660_s26, 4  ;;  %s33_s25 = int_to_ptr.vmem [resolvable:$true] %s32_s25  ;;  %s23_s27 = int_to_ptr.vmem [resolvable:$true] %s22_s27 }
   0x4   :  { %s565_s30 = scalar_lea.hbm %s767_s1, 128 }
   0x5   :  { %p566_p0 = scmp.ne.s32.totalorder %s767_s1, %s565_s30  ;;  %p569_p1 = scmp.lt.u32.totalorder %s565_s30, %s767_s1 }
   0x7   :  { %p571_p2 = pnand %p569_p1, %p566_p0 }
   0x9   :  { %574 = shalt.err (!%p571_p2)
}
   0xa   :  { %s575_s12 = scalar_lea.vmem %s33_s25, 128  ;;  %p580_p4 = scmp.lt.s32.totalorder %s33_s25, %s33_s25 }
   0xb   :  { %p576_p3 = scmp.ne.s32.totalorder %s33_s25, %s575_s12  ;;  %p581_p5 = scmp.lt.s32.totalorder %s575_s12, %s575_s12 }
   0xd   :  { %p582_p6 = por %p581_p5, %p580_p4 }
   0xf   :  { %p583_p7 = pnand %p582_p6, %p576_p3 }
  0x11   :  { %586 = shalt.err (!%p583_p7)
}
  0x12   :  { %35 = dma.hbm_to_vmem [thread:$0]  %s767_s1, 128, %s33_s25, [#allocation7]  }
  0x13   :  { %s587_s17 = scalar_lea.hbm %s766_s0, 128 }
  0x14   :  { %p588_p8 = scmp.ne.s32.totalorder %s766_s0, %s587_s17  ;;  %p591_p9 = scmp.lt.u32.totalorder %s587_s17, %s766_s0 }
  0x16   :  { %p593_p10 = pnand %p591_p9, %p588_p8 }
  0x18   :  { %596 = shalt.err (!%p593_p10)
}
  0x19   :  { %s597_s22 = scalar_lea.vmem %s23_s27, 128  ;;  %p602_p12 = scmp.lt.s32.totalorder %s23_s27, %s23_s27 }
  0x1a   :  { %p598_p11 = scmp.ne.s32.totalorder %s23_s27, %s597_s22  ;;  %p603_p13 = scmp.lt.s32.totalorder %s597_s22, %s597_s22 }
  0x1c   :  { %p604_p0 = por %p603_p13, %p602_p12 }
  0x1e   :  { %p605_p1 = pnand %p604_p0, %p598_p11 }
  0x20   :  { %608 = shalt.err (!%p605_p1)
}
  0x21   :  { %25 = dma.hbm_to_vmem [thread:$0]  %s766_s0, 128, %s23_s27, [#allocation4]  }
  0x22   :  { %s661_s24 = smov [#allocation8]   ;;  %s609_s29 = scalar_lea.hbm %s769_s3, 4096 }
  0x23   :  { %s43_s25 = sshll.u32 %s661_s24, 4  ;;  %p610_p2 = scmp.ne.s32.totalorder %s769_s3, %s609_s29  ;;  %s44_s25 = int_to_ptr.vmem [resolvable:$true] %s43_s25 }
  0x24   :  { %p613_p3 = scmp.lt.u32.totalorder %s609_s29, %s769_s3 }
  0x26   :  { %p615_p4 = pnand %p613_p3, %p610_p2 }
  0x28   :  { %618 = shalt.err (!%p615_p4)
}
  0x29   :  { %s619_s11 = scalar_lea.vmem %s44_s25, 4096  ;;  %p624_p6 = scmp.lt.s32.totalorder %s44_s25, %s44_s25 }
  0x2a   :  { %p620_p5 = scmp.ne.s32.totalorder %s44_s25, %s619_s11  ;;  %p625_p7 = scmp.lt.s32.totalorder %s619_s11, %s619_s11 }
  0x2c   :  { %p626_p8 = por %p625_p7, %p624_p6 }
  0x2e   :  { %p627_p9 = pnand %p626_p8, %p620_p5 }
  0x30   :  { %630 = shalt.err (!%p627_p9)
}
  0x31   :  { %s662_s0 = smov 128   ;;  %s663_s27 = smov 8  }
  0x32   :  { %49 = dma.hbm_to_vmem [thread:$0]  %s769_s3, 4096, %s44_s25, [#allocation7], %s662_s0, %s662_s0, %s663_s27  }
  0x33   :  { %653 = dma.done.wait [#allocation4], 128  }
  0x34   :  { %654 = vsyncadd [#allocation4], 4294967168 }
  0x35   :  { %655 = dma.done.wait [#allocation7], 4224  }
  0x36   :  { %656 = vsyncadd [#allocation7], 4294963072  ;;  %v664_v0 = vmov 0   ;;  %v68_v1 = vld [vmem:[#allocation6] sm:$0xff]  ;;  %vm90_vm0 = vcmask 1043456   ;;  %v66_v2 = vld [vmem:[#allocation3] sm:$0xff]  ;;  %v71_v39 = vlaneseq }
  0x37   :  { %129 = vmatprep.mubr.bf16.mxu0 %v664_v0  ;;  %v461_v3 = vcombine.high %v68_v1, %v68_v1  ;;  %v460_v4 = vcombine.low %v68_v1, %v68_v1  ;;  %v507_v5 = vld [vmem:[#allocation8 + $0x4] ss:$8 sps:$4 sm:$0xff]   ;;  %v509_v6 = vld [vmem:[#allocation8] ss:$8 sps:$4 sm:$0xff]   ;;  %v510_v7 = vld [vmem:[#allocation8 + $0x14] ss:$8 sps:$4 sm:$0xff]   ;;  %v67_v9 = vpack.c.bf16 %v66_v2, %v66_v2 }
  0x38   :  { %346 = vmatprep.subr.bf16.mxu1 %v507_v5  ;;  %vm86_vm1 = vcmask 64512   ;;  %v512_v10 = vld [vmem:[#allocation8 + $0x10] ss:$8 sps:$4 sm:$0xff]   ;;  %v513_v11 = vld [vmem:[#allocation8 + $0x24] ss:$8 sps:$4 sm:$0xff]   ;;  %v72_v40 = vshrl.u32 %v71_v39, 7 }
  0x39   :  { %462 = vmatprep.subr.msk.bf16.mxu0 %vm90_vm0, %v461_v3  ;;  %v92_v8 = vsel %vm90_vm0, %v460_v4, 0  ;;  %347 = vmatpush1.bf16.msra.mxu1 %v509_v6  ;;  %v515_v12 = vld [vmem:[#allocation8 + $0x20] ss:$8 sps:$4 sm:$0xff]   ;;  %v516_v13 = vld [vmem:[#allocation8 + $0x34] ss:$8 sps:$4 sm:$0xff]   ;;  %s665_s18 = smov [#allocation9]  }
  0x3a   :  { %98 = vmatpush1.bf16.msra.mxu0 %v92_v8  ;;  %348 = vmatprep.subr.bf16.mxu1 %v510_v7  ;;  %v518_v14 = vld [vmem:[#allocation8 + $0x30] ss:$8 sps:$4 sm:$0xff]   ;;  %v519_v15 = vld [vmem:[#allocation8 + $0x44] ss:$8 sps:$4 sm:$0xff]   ;;  %v521_v16 = vld [vmem:[#allocation8 + $0x40] ss:$8 sps:$4 sm:$0xff]   ;;  %v440_v8 = vstv %s772_s6 }
  0x3b   :  { %v522_v17 = vld [vmem:[#allocation8 + $0x54] ss:$8 sps:$4 sm:$0xff]   ;;  %v524_v18 = vld [vmem:[#allocation8 + $0x50] ss:$8 sps:$4 sm:$0xff]   ;;  %v525_v19 = vld [vmem:[#allocation8 + $0x64] ss:$8 sps:$4 sm:$0xff]  }
  0x3c   :  { %v527_v20 = vld [vmem:[#allocation8 + $0x60] ss:$8 sps:$4 sm:$0xff]   ;;  %v528_v21 = vld [vmem:[#allocation8 + $0x74] ss:$8 sps:$4 sm:$0xff]   ;;  %v530_v22 = vld [vmem:[#allocation8 + $0x70] ss:$8 sps:$4 sm:$0xff]  }
  0x3d   :  { %463 = vmatmul.mubr.msk.bf16.vlgmr.msra.gmra.mrb[0].mxu0 %vm86_vm1, %v67_v9  ;;  %349 = vmatpush1.bf16.msra.mxu1 %v512_v10  ;;  %v531_v23 = vld [vmem:[#allocation8 + $0x84] ss:$8 sps:$4 sm:$0xff]   ;;  %v533_v24 = vld [vmem:[#allocation8 + $0x80] ss:$8 sps:$4 sm:$0xff]   ;;  %v534_v25 = vld [vmem:[#allocation8 + $0x94] ss:$8 sps:$4 sm:$0xff]  }
  0x3e   :  { %350 = vmatprep.subr.bf16.mxu1 %v513_v11  ;;  %v536_v26 = vld [vmem:[#allocation8 + $0x90] ss:$8 sps:$4 sm:$0xff]   ;;  %v537_v27 = vld [vmem:[#allocation8 + $0xa4] ss:$8 sps:$4 sm:$0xff]   ;;  %v539_v28 = vld [vmem:[#allocation8 + $0xa0] ss:$8 sps:$4 sm:$0xff]  }
  0x3f   :  { %v540_v29 = vld [vmem:[#allocation8 + $0xb4] ss:$8 sps:$4 sm:$0xff]   ;;  %v542_v30 = vld [vmem:[#allocation8 + $0xb0] ss:$8 sps:$4 sm:$0xff]   ;;  %v543_v31 = vld [vmem:[#allocation8 + $0xc4] ss:$8 sps:$4 sm:$0xff]  }
  0x40   :  { %v545_v32 = vld [vmem:[#allocation8 + $0xc0] ss:$8 sps:$4 sm:$0xff]   ;;  %v546_v33 = vld [vmem:[#allocation8 + $0xd4] ss:$8 sps:$4 sm:$0xff]   ;;  %v548_v34 = vld [vmem:[#allocation8 + $0xd0] ss:$8 sps:$4 sm:$0xff]  }
  0x41   :  { %351 = vmatpush1.bf16.msra.mxu1 %v515_v12  ;;  %v549_v35 = vld [vmem:[#allocation8 + $0xe4] ss:$8 sps:$4 sm:$0xff]   ;;  %v551_v36 = vld [vmem:[#allocation8 + $0xe0] ss:$8 sps:$4 sm:$0xff]   ;;  %v552_v37 = vld [vmem:[#allocation8 + $0xf4] ss:$8 sps:$4 sm:$0xff]  }
  0x42   :  { %352 = vmatprep.subr.bf16.mxu1 %v516_v13  ;;  %v554_v38 = vld [vmem:[#allocation8 + $0xf0] ss:$8 sps:$4 sm:$0xff]   ;;  %v73_v41 = vsub.s32 0, %v72_v40  ;;  %v77_v43 = vsub.s32 1, %v72_v40  ;;  %s450_s19 = sshll.u32 %s665_s18, 4  ;;  %vm442_vm2 = vcmask 57344   ;;  %s451_s19 = int_to_ptr.vmem [resolvable:$true] %s450_s19 }
  0x43   :  { %v69_v42 = vld [vmem:[%s768_s2] sm:$0x3]  ;;  %s631_s20 = scalar_lea.vmem %s451_s19, 16  ;;  %s635_s21 = scalar_lea.vmem %s451_s19, 32 }
  0x44   :  { %v74_v44 = vrot.slane %v69_v42, %v73_v41  ;;  %v78_v45 = vrot.slane %v69_v42, %v77_v43  ;;  %v391_v56 = vld [vmem:[%s771_s5] sm:$0xff]  ;;  %p632_p10 = scmp.ne.s32.totalorder %s451_s19, %s631_s20  ;;  %p636_p11 = scmp.lt.s32.totalorder %s451_s19, %s451_s19 }
  0x45   :  { %353 = vmatpush1.bf16.msra.mxu1 %v518_v14  ;;  %v497_v57 = vcombine.high %v391_v56, %v391_v56  ;;  %v174_v58 = vld [vmem:[%s770_s4] sm:$0x3]  ;;  %v496_v7 = vcombine.low %v391_v56, %v391_v56  ;;  %p637_p12 = scmp.lt.s32.totalorder %s635_s21, %s631_s20 }
  0x46   :  { %354 = vmatprep.subr.bf16.mxu1 %v519_v15  ;;  %v179_v59 = vrot.slane %v174_v58, %v73_v41  ;;  %v183_v60 = vrot.slane %v174_v58, %v77_v43 }
  0x47   :  { %431 = vmatprep.mubr.bf16.mxu0 %v497_v57  ;;  %p638_p13 = por %p637_p12, %p636_p11 }
  0x49   :  { %355 = vmatpush1.bf16.msra.mxu1 %v521_v16  ;;  %p639_p0 = pnand %p638_p13, %p632_p10 }
  0x4a   :  { %356 = vmatprep.subr.bf16.mxu1 %v522_v17 }
  0x4d   :  { %357 = vmatpush1.bf16.msra.mxu1 %v524_v18 }
  0x4e   :  { %358 = vmatprep.subr.bf16.mxu1 %v525_v19 }
  0x51   :  { %359 = vmatpush1.bf16.msra.mxu1 %v527_v20 }
  0x52   :  { %360 = vmatprep.subr.bf16.mxu1 %v528_v21 }
  0x55   :  { %361 = vmatpush1.bf16.msra.mxu1 %v530_v22 }
  0x56   :  { %362 = vmatprep.subr.bf16.mxu1 %v531_v23 }
  0x59   :  { %363 = vmatpush1.bf16.msra.mxu1 %v533_v24 }
  0x5a   :  { %364 = vmatprep.subr.bf16.mxu1 %v534_v25 }
  0x5d   :  { %365 = vmatpush1.bf16.msra.mxu1 %v536_v26 }
  0x5e   :  { %366 = vmatprep.subr.bf16.mxu1 %v537_v27 }
  0x61   :  { %367 = vmatpush1.bf16.msra.mxu1 %v539_v28 }
  0x62   :  { %368 = vmatprep.subr.bf16.mxu1 %v540_v29 }
  0x65   :  { %369 = vmatpush1.bf16.msra.mxu1 %v542_v30 }
  0x66   :  { %370 = vmatprep.subr.bf16.mxu1 %v543_v31 }
  0x69   :  { %371 = vmatpush1.bf16.msra.mxu1 %v545_v32 }
  0x6a   :  { %372 = vmatprep.subr.bf16.mxu1 %v546_v33 }
  0x6d   :  { %373 = vmatpush1.bf16.msra.mxu1 %v548_v34 }
  0x6e   :  { %374 = vmatprep.subr.bf16.mxu1 %v549_v35 }
  0x71   :  { %375 = vmatpush1.bf16.msra.mxu1 %v551_v36 }
  0x72   :  { %376 = vmatprep.subr.bf16.mxu1 %v552_v37 }
  0x75   :  { %377 = vmatpush1.bf16.msra.mxu1 %v554_v38 }
 0x110   :  { %v131_v46 = vpop.f32.mrb[0].mxu0 }
 0x111   :  { %v132_v47 = vadd.f32 %v131_v46, %v74_v44  ;;  %v133_v48 = vpop.f32.mrb[1].mxu0 }
 0x112   :  { %v134_v49 = vadd.f32 %v133_v48, %v78_v45  ;;  %v135_v50 = vpop.f32.mrb[2].mxu0 }
 0x113   :  { %v138_v51 = vpack.c.bf16 %v132_v47, %v132_v47  ;;  %v136_v52 = vpop.f32.mrb[3].mxu0 }
 0x114   :  { %v139_v53 = vpack.c.bf16 %v134_v49, %v134_v49 }
 0x116   :  { %557 = vtanh.bf16 %v139_v53 }
 0x117   :  { %559 = vtanh.bf16 %v138_v51 }
 0x121   :  { %v558_v54 = vpop.eup %557 }
 0x122   :  { %v560_v55 = vpop.eup %559  ;;  %378 = vmatprep.mubr.bf16.mxu1 %v558_v54 }
 0x123   :  { %379 = vmatmul.mubr.bf16.vlgmr.msra.gmra.mrb[0].mxu1 %v560_v55 }
 0x1f6   :  { %v380_v61 = vpop.f32.mrb[0].mxu1 }
 0x1f7   :  { %v381_v62 = vadd.f32 %v380_v61, %v179_v59  ;;  %v382_v63 = vpop.f32.mrb[1].mxu1 }
 0x1f8   :  { %v383_v0 = vadd.f32 %v382_v63, %v183_v60  ;;  %v384_v1 = vpop.f32.mrb[2].mxu1 }
 0x1f9   :  { %v387_v2 = vpack.c.bf16 %v381_v62, %v381_v62  ;;  %v385_v3 = vpop.f32.mrb[3].mxu1 }
 0x1fa   :  { %v388_v4 = vpack.c.bf16 %v383_v0, %v383_v0 }
 0x1fc   :  { %561 = vtanh.bf16 %v388_v4 }
 0x1fd   :  { %563 = vtanh.bf16 %v387_v2 }
 0x207   :  { %v562_v5 = vpop.eup %561 }
 0x208   :  { %v564_v6 = vpop.eup %563  ;;  %399 = vmatprep.subr.bf16.mxu0 %v562_v5 }
 0x209   :  { %400 = vmatpush1.bf16.xpose.msra.mxu0 %v564_v6 }
 0x210   :  { %432 = vmatmul.mubr.bf16.vlgmr.msra.gmra.mrb[4].mxu0 %v496_v7 }
 0x2e3   :  { %v433_v9 = vpop.f32.mrb[4].mxu0 }
 0x2e4   :  { %v441_v10 = vadd.f32 %v440_v8, %v433_v9  ;;  %v435_v11 = vpop.f32.mrb[5].mxu0 }
 0x2e5   :  { %v436_v12 = vpop.f32.mrb[6].mxu0 }
 0x2e6   :  { %v437_v13 = vpop.f32.mrb[7].mxu0  ;;  %443 = vst.msk [vmem:[#allocation9] sm:$0x1] %vm442_vm2, %v441_v10 }
 0x2e7   :  { %642 = shalt.err (!%p639_p0)
}
 0x2e8   :  { %s643_s1 = scalar_lea.hbm %s773_s7, 16 }
 0x2e9   :  { %p644_p1 = scmp.ne.s32.totalorder %s773_s7, %s643_s1  ;;  %p647_p2 = scmp.lt.u32.totalorder %s643_s1, %s773_s7 }
 0x2eb   :  { %p649_p3 = pnand %p647_p2, %p644_p1 }
 0x2ed   :  { %652 = shalt.err (!%p649_p3)
}
 0x2ee   :  { %453 = dma.vmem_to_hbm [thread:$0]  %s451_s19, 16, %s773_s7, [#allocation5]  }
 0x2ef   :  { %657 = dma.done.wait [#allocation5], 16  }
 0x2f0   :  { %658 = vsyncadd [#allocation5], 4294967280 }
 0x2f1   :  { %457 = vsyncpa [#allocation4], 1 }
 0x2f2   :  { %458 = vsyncpa [#allocation7], 1 }
 0x2f3   :  { %459 = vsyncpa [#allocation5], 1 }

</bundles_post_ra>
